<compile_context>
chip_gen: v5e
topology: v5e:2x2
jax: 0.10.0
libtpu: 0.0.40
codegen_flags: <defaults>
</compile_context>

<pallas_src>
import functools

import jax
import jax.numpy as jnp
from jax.experimental import pallas as pl
from jax.experimental.pallas import tpu as pltpu


def _round_up(v: int, m: int) -> int:
    return ((v + m - 1) // m) * m


def _round_down(v: int, m: int) -> int:
    return (v // m) * m


def _top2gate_kernel(x_ref, w_ref, cw_ref, stats_ref, *,
                     inv_temperature: float, total_tokens: int, block_tokens: int):
    i = pl.program_id(0)

    # --- wg linear with the weight in its native torch (E, D) layout ---------------
    # logits[t, e] = sum_d x[t, d] * w[e, d]   (MXU, inputs in native dtype, f32 accum)
    logits = jax.lax.dot_general(
        x_ref[...], w_ref[...],
        dimension_numbers=(((1,), (1,)), ((), ())),
        preferred_element_type=jnp.float32)                      # (TM, E) f32
    logits = logits * inv_temperature

    # --- softmax over experts (dim=1); reciprocal rides the EUP slot ----------------
    m = jnp.max(logits, axis=-1, keepdims=True)
    e = jnp.exp(logits - m)
    denom = jnp.sum(e, axis=-1, keepdims=True)
    gates = e * pl.reciprocal(denom, approx=True)                # (TM, E)

    tm, n_exp = gates.shape
    expert_idx = jax.lax.broadcasted_iota(jnp.int32, (tm, n_exp), 1)

    # --- top-2 selection: argmax, mask, argmax again (boolean masks only) -----------
    idx1 = jnp.argmax(gates, axis=-1)[:, None]                   # (TM, 1)
    top1 = expert_idx == idx1                                    # bool one-hot top-1
    idx2 = jnp.argmax(jnp.where(top1, -jnp.inf, gates), axis=-1)[:, None]
    top2 = expert_idx == idx2                                    # bool one-hot top-2

    # scatter(top2 probs at top2 idx) == keep gates at top-1/top-2 positions
    combine = jnp.where(top1 | top2, gates, 0.0)                 # (TM, E)

    # permute(1, 0): lane-dense (E, TM) store; the XLU transpose is free filler here.
    cw_ref[...] = jnp.transpose(combine, (1, 0)).astype(cw_ref.dtype)

    # --- per-tile partial sums for the auxiliary loss (ragged tail rows masked) -----
    row = jax.lax.broadcasted_iota(jnp.int32, (tm, 1), 0)
    valid = (i * block_tokens + row) < total_tokens              # (TM, 1) bool
    gates_sum = jnp.sum(jnp.where(valid, gates, 0.0), axis=0, keepdims=True)       # (1, E)
    top1_sum = jnp.sum(jnp.where(valid & top1, 1.0, 0.0), axis=0, keepdims=True)   # (1, E)
    # direct sub-ref stores (stats block is (2, E); leading grid dim squeezed away)
    stats_ref[0:1, :] = gates_sum
    stats_ref[1:2, :] = top1_sum


def top2gate_forward(x, wg_weight, *, temperature: float = 1.0,
                     block_tokens: int = 2048, out_dtype=jnp.float32):
    """Top2Gate forward (token-level gating, gshard=False, moe_auxiliary_loss=True).

    x:         (T, D) tokens (batch*seq flattened), f32 or bf16.
    wg_weight: (E, D) torch Linear.weight layout (kept native; never transposed).
    Returns (l_aux, combine_weights[(E, T)], dispatch_mask=None, metadata={}).
    """
    T, D = x.shape
    E = wg_weight.shape[0]
    assert wg_weight.shape == (E, D), "wg_weight must be (num_experts, model_dim)"
    assert block_tokens % 128 == 0, "block_tokens must be a multiple of 128"

    w = wg_weight.astype(x.dtype)            # native (E, D) layout, MXU dtype match

    isz_x = jnp.dtype(x.dtype).itemsize
    isz_o = jnp.dtype(out_dtype).itemsize
    d_pad = _round_up(D, 128)                # lane padding of the D-minor blocks
    e_sub = _round_up(E, 8)                  # sublane padding of the E-major blocks

    # Physical VMEM per TensorCore (128 MiB on v5e/v6e, 64 MiB on v7x); budget 75%.
    try:
        vmem_cap = int(getattr(pltpu.get_tpu_info(), "vmem_capacity_bytes",
                               128 * 1024 * 1024))
    except Exception:  # conservative fallback when the query is unavailable
        vmem_cap = 128 * 1024 * 1024
    budget = int(vmem_cap * 0.75)

    # Padded VMEM cost: per-token (double-buffered x rows + double-buffered (E, tm)
    # output columns + ~10 (tm,128)-padded f32 intermediates) and fixed overhead
    # (resident (E, D) weight at default buffer count, stats blocks, slack).
    per_token = 2 * d_pad * isz_x + 2 * e_sub * isz_o + 10 * 128 * 4
    fixed = (2 * e_sub * d_pad * isz_x       # weight (native layout), 2 buffers
             + 2 * 8 * 128 * 4               # (2, E) stats blocks, padded, 2 buffers
             + (2 << 20))                    # slack for misc compiler temporaries
    tm_budget = max(128, _round_down(max(budget - fixed, 0) // per_token, 128))
    tm_cap = min(block_tokens, tm_budget)

    # Guarantee >=2 grid tiles when T is big enough, so the "parallel" token axis
    # shards across both TensorCores on v7x megacore (no effect on v5e/v6e).
    if T >= 256:
        tm = min(tm_cap, _round_up(pl.cdiv(T, 2), 128))
    else:
        tm = min(tm_cap, T)
    if tm >= T:
        tm = T                                # single full tile (block == array dims)
    else:
        tm = max(128, _round_down(tm, 128))   # tiled path: 128-aligned (E, tm) stores
    num_tiles = pl.cdiv(T, tm)

    def _vmem_needed(tm_):
        tm_sub = _round_up(tm_, 8)
        return (2 * tm_sub * d_pad * isz_x                 # x double buffer
                + 2 * e_sub * _round_up(tm_, 128) * isz_o  # cw double buffer
                + 10 * tm_sub * 128 * 4                    # padded (tm, E) intermediates
                + fixed)

    vmem_limit = int(min(max(_vmem_needed(tm), 32 * 1024 * 1024), budget))

    kernel = functools.partial(
        _top2gate_kernel,
        inv_temperature=float(1.0 / temperature),
        total_tokens=T,
        block_tokens=tm,
    )

    combine_weights, stats = pl.pallas_call(
        kernel,
        grid=(num_tiles,),
        in_specs=[
            pl.BlockSpec((tm, D), lambda i: (i, 0)),          # x token tile (streamed)
            pl.BlockSpec((E, D), lambda i: (0, 0)),           # weight, native layout
        ],
        out_specs=(
            pl.BlockSpec((E, tm), lambda i: (0, i)),          # (E, T) lane-dense output
            pl.BlockSpec((None, 2, E), lambda i: (i, 0, 0)),  # per-tile l_aux partials
        ),
        out_shape=(
            jax.ShapeDtypeStruct((E, T), out_dtype),
            jax.ShapeDtypeStruct((num_tiles, 2, E), jnp.float32),
        ),
        compiler_params=pltpu.CompilerParams(
            dimension_semantics=("parallel",),
            vmem_limit_bytes=vmem_limit,
        ),
    )(x, w)

    # Finalize auxiliary loss from the per-tile partial sums (tiny host-side reduce).
    sums = jnp.sum(stats, axis=0)                   # (2, E)
    me = sums[0] / T
    ce = sums[1] / T
    l_aux = jnp.mean(me * ce) * float(E * E)

    # TODO(synk): 'metadata' logging histograms (torch.histc), the gshard
    # (top2gating_dist) branch and the sample-level branch are not reproduced here.
    return l_aux, combine_weights, None, {}


def _reference(x, wg_weight, temperature=1.0):
    logits = x.astype(jnp.float32) @ wg_weight.astype(jnp.float32).T
    gates = jax.nn.softmax(logits / temperature, axis=1)
    T, E = gates.shape
    idx1 = jnp.argmax(gates, axis=-1)
    m1 = jax.nn.one_hot(idx1, E, dtype=jnp.float32)
    idx2 = jnp.argmax(jnp.where(m1 > 0, -jnp.inf, gates), axis=-1)
    m2 = jax.nn.one_hot(idx2, E, dtype=jnp.float32)
    cw = (gates * (m1 + m2)).T
    l_aux = jnp.mean(jnp.mean(gates, 0) * jnp.mean(m1, 0)) * E * E
    return l_aux, cw


if __name__ == "__main__":
    # Small shapes: 16 tokens (batch=2 * seq=8 flattened), model_dim=32, 8 experts.
    T, D, E = 16, 32, 8
    key = jax.random.PRNGKey(0)
    kx, kw, kx2, kx3 = jax.random.split(key, 4)
    x = jax.random.normal(kx, (T, D), dtype=jnp.float32)
    # Deterministic init of wg.weight (E, D), std = 1/sqrt(D) (mitchell-style).
    wg_weight = jax.random.normal(kw, (E, D), dtype=jnp.float32) * (1.0 / D ** 0.5)

    fwd = jax.jit(functools.partial(top2gate_forward, temperature=1.0))
    l_aux, combine_weights, dispatch_mask, metadata = fwd(x, wg_weight)
    jax.block_until_ready((l_aux, combine_weights))

    l_ref, cw_ref = _reference(x, wg_weight)
    assert combine_weights.shape == (E, T)
    assert jnp.allclose(combine_weights, cw_ref, atol=5e-3), "combine_weights mismatch"
    assert jnp.allclose(l_aux, l_ref, rtol=5e-3, atol=1e-5), "l_aux mismatch"

    # Multi-tile path (grid > 1) with a ragged tail to exercise tail masking.
    T2 = 200
    x2 = jax.random.normal(kx2, (T2, D), dtype=jnp.float32)
    l2, cw2, _, _ = top2gate_forward(x2, wg_weight, block_tokens=128)
    jax.block_until_ready((l2, cw2))
    l2_ref, cw2_ref = _reference(x2, wg_weight)
    assert cw2.shape == (E, T2)
    assert jnp.allclose(cw2, cw2_ref, atol=5e-3), "tiled combine_weights mismatch"
    assert jnp.allclose(l2, l2_ref, rtol=5e-3, atol=1e-5), "tiled l_aux mismatch"

    # Default-config path with T >= 256: exercises the megacore >=2-tile split and a
    # ragged final tile under the budget-derived tile size.
    T3 = 500
    x3 = jax.random.normal(kx3, (T3, D), dtype=jnp.float32)
    l3, cw3, _, _ = top2gate_forward(x3, wg_weight)
    jax.block_until_ready((l3, cw3))
    l3_ref, cw3_ref = _reference(x3, wg_weight)
    assert cw3.shape == (E, T3)
    assert jnp.allclose(cw3, cw3_ref, atol=5e-3), "megacore-split combine_weights mismatch"
    assert jnp.allclose(l3, l3_ref, rtol=5e-3, atol=1e-5), "megacore-split l_aux mismatch"

    # bf16 streaming path (x and weight kept bf16 into the MXU, f32 accumulation).
    lb, cwb, _, _ = top2gate_forward(x.astype(jnp.bfloat16),
                                     wg_weight.astype(jnp.bfloat16))
    jax.block_until_ready((lb, cwb))
    _, cwb_ref = _reference(x.astype(jnp.bfloat16), wg_weight.astype(jnp.bfloat16))
    assert jnp.allclose(cwb, cwb_ref, atol=5e-3), "bf16 combine_weights mismatch"

    print("KERNEL_OK")
</pallas_src>

<mosaic_0001>
module attributes {stable_mosaic.version = 11 : i64} {
  func.func @_top2gate_kernel(%arg0: i32, %arg1: memref<16x32xf32, #tpu.memory_space<vmem>>, %arg2: memref<8x32xf32, #tpu.memory_space<vmem>>, %arg3: memref<8x16xf32, #tpu.memory_space<vmem>>, %arg4: memref<1x2x8xf32, #tpu.memory_space<vmem>>) attributes {dimension_semantics = [#tpu.dimension_semantics<parallel>], iteration_bounds = array<i64: 1>, scalar_prefetch = 0 : i64, scratch_operands = 0 : i64, tpu.core_type = #tpu.core_type<tc>, window_params = [{transform_indices = @transform_0, window_bounds = array<i64: 16, 32>}, {pipeline_mode = #tpu.pipeline_mode<synchronous>, transform_indices = @transform_1, window_bounds = array<i64: 8, 32>}, {transform_indices = @transform_2, window_bounds = array<i64: 8, 16>}, {transform_indices = @transform_3, window_bounds = array<i64: 1, 2, 8>}]} {
    %c0 = arith.constant 0 : index
    %c0_0 = arith.constant 0 : index
    %0 = vector.load %arg1[%c0, %c0_0] : memref<16x32xf32, #tpu.memory_space<vmem>>, vector<16x32xf32>
    %c0_1 = arith.constant 0 : index
    %c0_2 = arith.constant 0 : index
    %1 = vector.load %arg2[%c0_1, %c0_2] : memref<8x32xf32, #tpu.memory_space<vmem>>, vector<8x32xf32>
    %cst = arith.constant dense<0.000000e+00> : vector<16x8xf32>
    %2 = tpu.matmul %0, %1, %cst {dimension_numbers = #tpu.dot_dimension_numbers<[1], [1], [0], [0], [0, 0, 1, 0], [], []>} : vector<16x32xf32>, vector<8x32xf32>, vector<16x8xf32> -> vector<16x8xf32>
    %cst_3 = arith.constant 1.000000e+00 : f32
    %3 = vector.broadcast %cst_3 : f32 to vector<16x8xf32>
    %4 = arith.mulf %2, %3 : vector<16x8xf32>
    %cst_4 = arith.constant dense<0xFF800000> : vector<16xf32>
    %5 = vector.multi_reduction <maximumf>, %4, %cst_4 [1] : vector<16x8xf32> to vector<16xf32>
    %6 = vector.shape_cast %5 : vector<16xf32> to vector<16x1xf32>
    %7 = vector.broadcast %6 : vector<16x1xf32> to vector<16x8xf32>
    %8 = arith.subf %4, %7 : vector<16x8xf32>
    %9 = math.exp %8 : vector<16x8xf32>
    %cst_5 = arith.constant dense<0.000000e+00> : vector<16xf32>
    %10 = vector.multi_reduction <add>, %9, %cst_5 [1] : vector<16x8xf32> to vector<16xf32>
    %11 = vector.shape_cast %10 : vector<16xf32> to vector<16x1xf32>
    %12 = tpu.reciprocal %11 {approx = true} : vector<16x1xf32> -> vector<16x1xf32>
    %13 = vector.broadcast %12 : vector<16x1xf32> to vector<16x8xf32>
    %14 = arith.mulf %9, %13 : vector<16x8xf32>
    %15 = tpu.iota {dimensions = array<i32: 1>} : vector<16x8xi32>
    %16 = tpu.reduce_index %14 {axis = 1 : i32, kind = #tpu.reduction_kind<arg_max>} : vector<16x8xf32> -> vector<16xi32>
    %17 = vector.shape_cast %16 : vector<16xi32> to vector<16x1xi32>
    %18 = vector.broadcast %17 : vector<16x1xi32> to vector<16x8xi32>
    %19 = arith.cmpi eq, %15, %18 : vector<16x8xi32>
    %cst_6 = arith.constant 0xFF800000 : f32
    %20 = vector.broadcast %cst_6 : f32 to vector<16x8xf32>
    %21 = arith.select %19, %20, %14 : vector<16x8xi1>, vector<16x8xf32>
    %22 = tpu.reduce_index %21 {axis = 1 : i32, kind = #tpu.reduction_kind<arg_max>} : vector<16x8xf32> -> vector<16xi32>
    %23 = vector.shape_cast %22 : vector<16xi32> to vector<16x1xi32>
    %24 = vector.broadcast %23 : vector<16x1xi32> to vector<16x8xi32>
    %25 = arith.cmpi eq, %15, %24 : vector<16x8xi32>
    %26 = arith.ori %19, %25 : vector<16x8xi1>
    %cst_7 = arith.constant 0.000000e+00 : f32
    %27 = vector.broadcast %cst_7 : f32 to vector<16x8xf32>
    %28 = arith.select %26, %14, %27 : vector<16x8xi1>, vector<16x8xf32>
    %29 = tpu.transpose %28, [1, 0] : vector<16x8xf32> -> vector<8x16xf32>
    %c0_8 = arith.constant 0 : index
    %c0_9 = arith.constant 0 : index
    %30 = vector.load %arg3[%c0_8, %c0_9] : memref<8x16xf32, #tpu.memory_space<vmem>>, vector<8x16xf32>
    tpu.vector_store %arg3[%c0_8, %c0_9], %29 {strides = array<i32>} : memref<8x16xf32, #tpu.memory_space<vmem>>, vector<8x16xf32>,
    %31 = tpu.iota {dimensions = array<i32: 0>} : vector<16x1xi32>
    %c16_i32 = arith.constant 16 : i32
    %32 = arith.muli %arg0, %c16_i32 : i32
    %33 = vector.broadcast %32 : i32 to vector<16x1xi32>
    %34 = arith.addi %33, %31 : vector<16x1xi32>
    %c16_i32_10 = arith.constant 16 : i32
    %35 = vector.broadcast %c16_i32_10 : i32 to vector<16x1xi32>
    %36 = arith.cmpi slt, %34, %35 : vector<16x1xi32>
    %cst_11 = arith.constant 0.000000e+00 : f32
    %37 = vector.shape_cast %36 : vector<16x1xi1> to vector<16x1xi1>
    %38 = vector.broadcast %37 : vector<16x1xi1> to vector<16x8xi1>
    %39 = vector.broadcast %cst_11 : f32 to vector<16x8xf32>
    %40 = arith.select %38, %14, %39 : vector<16x8xi1>, vector<16x8xf32>
    %cst_12 = arith.constant dense<0.000000e+00> : vector<8xf32>
    %41 = vector.multi_reduction <add>, %40, %cst_12 [0] : vector<16x8xf32> to vector<8xf32>
    %42 = vector.shape_cast %41 : vector<8xf32> to vector<1x8xf32>
    %43 = vector.broadcast %36 : vector<16x1xi1> to vector<16x8xi1>
    %44 = arith.andi %43, %19 : vector<16x8xi1>
    %cst_13 = arith.constant 1.000000e+00 : f32
    %cst_14 = arith.constant 0.000000e+00 : f32
    %45 = vector.broadcast %cst_13 : f32 to vector<16x8xf32>
    %46 = vector.broadcast %cst_14 : f32 to vector<16x8xf32>
    %47 = arith.select %44, %45, %46 : vector<16x8xi1>, vector<16x8xf32>
    %cst_15 = arith.constant dense<0.000000e+00> : vector<8xf32>
    %48 = vector.multi_reduction <add>, %47, %cst_15 [0] : vector<16x8xf32> to vector<8xf32>
    %49 = vector.shape_cast %48 : vector<8xf32> to vector<1x8xf32>
    %c0_16 = arith.constant 0 : index
    %c0_17 = arith.constant 0 : index
    %c0_18 = arith.constant 0 : index
    %50 = vector.load %arg4[%c0_16, %c0_17, %c0_18] : memref<1x2x8xf32, #tpu.memory_space<vmem>>, vector<1x1x8xf32>
    %51 = vector.shape_cast %50 : vector<1x1x8xf32> to vector<1x8xf32>
    %52 = vector.shape_cast %42 : vector<1x8xf32> to vector<1x1x8xf32>
    tpu.vector_store %arg4[%c0_16, %c0_17, %c0_18], %52 {strides = array<i32>} : memref<1x2x8xf32, #tpu.memory_space<vmem>>, vector<1x1x8xf32>,
    %c0_19 = arith.constant 0 : index
    %c1 = arith.constant 1 : index
    %c0_20 = arith.constant 0 : index
    %53 = vector.load %arg4[%c0_19, %c1, %c0_20] : memref<1x2x8xf32, #tpu.memory_space<vmem>>, vector<1x1x8xf32>
    %54 = vector.shape_cast %53 : vector<1x1x8xf32> to vector<1x8xf32>
    %55 = vector.shape_cast %49 : vector<1x8xf32> to vector<1x1x8xf32>
    tpu.vector_store %arg4[%c0_19, %c1, %c0_20], %55 {strides = array<i32>} : memref<1x2x8xf32, #tpu.memory_space<vmem>>, vector<1x1x8xf32>,
    return
  }
  func.func @transform_0(%arg0: i32) -> (i32, i32) {
    %c0_i32 = arith.constant 0 : i32
    %c0_i32_0 = arith.constant 0 : i32
    return %arg0, %c0_i32 : i32, i32
  }
  func.func @transform_1(%arg0: i32) -> (i32, i32) {
    %c0_i32 = arith.constant 0 : i32
    %c0_i32_0 = arith.constant 0 : i32
    %c0_i32_1 = arith.constant 0 : i32
    return %c0_i32, %c0_i32_0 : i32, i32
  }
  func.func @transform_2(%arg0: i32) -> (i32, i32) {
    %c0_i32 = arith.constant 0 : i32
    %c0_i32_0 = arith.constant 0 : i32
    return %c0_i32, %arg0 : i32, i32
  }
  func.func @transform_3(%arg0: i32) -> (i32, i32, i32) {
    %c0_i32 = arith.constant 0 : i32
    %c0_i32_0 = arith.constant 0 : i32
    %c0_i32_1 = arith.constant 0 : i32
    return %arg0, %c0_i32, %c0_i32_0 : i32, i32, i32
  }
}

</mosaic_0001>

<bundles_post_ra>
// kernel: top2gate_forward.1
= control target key start
LH: loop header
LB: loop body
LE: loop exit
PB: predicated region body
PF: predicated region fallthrough
CT: control target
= control target key end

     0   :  { %9 = vsyncpa [#allocation3], 0  ;;  %s380_s0 = inlined_call_operand.hbm [shape: f32[16,32], index: 0, kind: input, shape index: {}]   ;;  %s381_s1 = inlined_call_operand.hbm [shape: f32[8,32], index: 1, kind: input, shape index: {}]   ;;  %s382_s2 = inlined_call_operand.hbm [shape: f32[8,16], index: 2, kind: output, shape index: {0}]   ;;  %s383_s3 = inlined_call_operand.vmem [shape: f32[1,2,8], index: 3, kind: output, shape index: {1}]  }
   0x1   :  { %10 = vsyncpa [#allocation6], 0 }
   0x2   :  { %11 = vsyncpa [#allocation4], 0  ;;  %s16_s14 = sshll.u32 %s380_s0, 4  ;;  %s319_s15 = smov [#allocation2]   ;;  %s17_s14 = int_to_ptr.hbm [resolvable:$true] %s16_s14 }
   0x3   :  { %s18_s16 = sshll.u32 %s319_s15, 4  ;;  %s30_s19 = sshll.u32 %s381_s1, 4  ;;  %s19_s16 = int_to_ptr.vmem [resolvable:$true] %s18_s16  ;;  %s31_s19 = int_to_ptr.hbm [resolvable:$true] %s30_s19 }
   0x4   :  { %s320_s20 = smov 128   ;;  %s321_s21 = smov 8  }
   0x5   :  { %24 = dma.hbm_to_vmem [thread:$0]  %s17_s14, 256, %s19_s16, [#allocation3], %s320_s20, %s320_s20, %s321_s21  }
   0x6   :  { %s322_s22 = smov [#allocation5]  }
   0x7   :  { %s32_s23 = sshll.u32 %s322_s22, 4  ;;  %s33_s23 = int_to_ptr.vmem [resolvable:$true] %s32_s23 }
   0x8   :  { %35 = dma.hbm_to_vmem [thread:$0]  %s31_s19, 128, %s33_s23, [#allocation6]  }
   0x9   :  { %313 = dma.done.wait [#allocation3], 256  }
   0xa   :  { %314 = vsyncadd [#allocation3], 4294967040 }
   0xb   :  { %315 = dma.done.wait [#allocation6], 128  }
   0xc   :  { %316 = vsyncadd [#allocation6], 4294967168  ;;  %vm47_vm0 = vcmask 261120   ;;  %v46_v0 = vld [vmem:[#allocation5] sm:$0xff]  ;;  %v44_v1 = vld [vmem:[#allocation2] sm:$0xff]  ;;  %vm80_vm1 = vcmask 64512   ;;  %v103_v34 = vlaneseq }
   0xd   :  { %223 = vmatpush.xpose.msk.msra.mxu0 %vm47_vm0, %v46_v0  ;;  %226 = vmatpush.xpose.msk.msra.mxu1 %vm47_vm0, %v46_v0  ;;  %v45_v2 = vld [vmem:[#allocation2 + $0x8] sm:$0xff]  ;;  %vm198_vm2 = vcmask 57344   ;;  %v323_v39 = vmov 0.0   ;;  %s324_s26 = smov [#allocation7]   ;;  %s208_s30 = sshll.u32 %s382_s2, 4  ;;  %vm159_vm9 = vcmask 130048   ;;  %s209_s30 = int_to_ptr.hbm [resolvable:$true] %s208_s30 }
   0xe   :  { %v104_v35 = vand.u32 127, %v103_v34  ;;  %s206_s27 = sshll.u32 %s324_s26, 4  ;;  %s207_s27 = int_to_ptr.vmem [resolvable:$true] %s206_s27 }
  0x10   :  { %224 = vmatmul.msk.f32.vlgmr.msra.gmra.mxu0 %vm47_vm0, %v44_v1  ;;  %225 = vmatmul.msk.f32.vlgmr.msra.gmra.mxu1 %vm47_vm0, %v45_v2 }
  0x8d   :  { %v74_v3 = vpop.f32.mrf.mxu0  ;;  %v77_v5 = vpop.f32.mrf.mxu1 }
  0x8e   :  { %v81_v4 = vsel %vm80_vm1, %v74_v3, -inf  ;;  %v84_v6 = vsel %vm80_vm1, %v77_v5, -inf }
  0x8f   :  { %82 = vmax.xlane.f32.xlu0 %v81_v4 }
  0x97   :  { %85 = vmax.xlane.f32.xlu0 %v84_v6 }
 0x102   :  { %v83_v7 = vpop.xlane.xlu0 %82 }
 0x103   :  { %v87_v8 = vsub.f32 %v74_v3, %v83_v7 }
 0x105   :  { %v89_v9 = vmul.f32 1.442695, %v87_v8 }
 0x107   :  { %233 = vpow2.f32 %v89_v9 }
 0x10a   :  { %v86_v10 = vpop.xlane.xlu0 %85 }
 0x10b   :  { %v88_v11 = vsub.f32 %v77_v5, %v86_v10 }
 0x10d   :  { %v234_v12 = vpop.eup %233  ;;  %v91_v13 = vmul.f32 1.442695, %v88_v11 }
 0x10e   :  { %v93_v14 = vsel %vm80_vm1, %v234_v12, 0.0 }
 0x10f   :  { %235 = vpow2.f32 %v91_v13  ;;  %94 = vadd.xlane.f32.xlu1 %v93_v14 }
 0x115   :  { %v236_v15 = vpop.eup %235 }
 0x116   :  { %v96_v16 = vsel %vm80_vm1, %v236_v15, 0.0 }
 0x117   :  { %97 = vadd.xlane.f32.xlu1 %v96_v16 }
 0x182   :  { %v95_v17 = vpop.xlane.xlu1 %94 }
 0x183   :  { %237 = vrcp.f32 %v95_v17 }
 0x189   :  { %v238_v18 = vpop.eup %237 }
 0x18a   :  { %v101_v19 = vmul.f32 %v238_v18, %v234_v12  ;;  %v98_v20 = vpop.xlane.xlu1 %97 }
 0x18b   :  { %239 = vrcp.f32 %v98_v20 }
 0x18c   :  { %v105_v21 = vsel %vm80_vm1, %v101_v19, -inf  ;;  %v176_v24 = vsel %vm80_vm1, %v101_v19, 0.0 }
 0x18d   :  { %106 = vmax.index.xlane.f32.xlu2 %v105_v21 }
 0x191   :  { %v240_v22 = vpop.eup %239 }
 0x192   :  { %v102_v23 = vmul.f32 %v240_v22, %v236_v15 }
 0x194   :  { %v177_v25 = vsel %vm80_vm1, %v102_v23, 0.0  ;;  %v108_v26 = vsel %vm80_vm1, %v102_v23, -inf }
 0x195   :  { %v178_v27 = vadd.f32 %v177_v25, %v176_v24  ;;  %109 = vmax.index.xlane.f32.xlu2 %v108_v26 }
 0x197   :  { %v179_v28 = vrot.slane %v178_v27, 4 }
 0x199   :  { %v180_v29 = vadd.f32 %v179_v28, %v178_v27 }
 0x19b   :  { %v181_v30 = vrot.slane %v180_v29, 2 }
 0x19d   :  { %v182_v31 = vadd.f32 %v181_v30, %v180_v29 }
 0x19f   :  { %v183_v32 = vrot.slane %v182_v31, 1 }
 0x1a1   :  { %v184_v33 = vadd.f32 %v183_v32, %v182_v31 }
 0x1a3   :  { %199 = vst.msk [vmem:[%s383_s3] sm:$0x1] %vm198_vm2, %v184_v33 }
 0x200   :  { %v107_v36 = vpop.xlane.xlu2 %106 }
 0x201   :  { %vm111_vm3 = vcmp.eq.s32.totalorder %v104_v35, %v107_v36 }
 0x202   :  { %v113_v37 = vsel %vm111_vm3, -inf, %v101_v19  ;;  %v187_v40 = vsel %vm111_vm3, 1.0, %v323_v39 }
 0x203   :  { %v115_v38 = vsel %vm80_vm1, %v113_v37, -inf  ;;  %v189_v44 = vsel %vm80_vm1, %v187_v40, 0.0 }
 0x204   :  { %116 = vmax.index.xlane.f32.xlu0 %v115_v38 }
 0x208   :  { %v110_v41 = vpop.xlane.xlu2 %109 }
 0x209   :  { %vm112_vm4 = vcmp.eq.s32.totalorder %v104_v35, %v110_v41 }
 0x20a   :  { %v188_v42 = vsel %vm112_vm4, 1.0, %v323_v39  ;;  %v114_v43 = vsel %vm112_vm4, -inf, %v102_v23 }
 0x20b   :  { %v190_v45 = vsel %vm80_vm1, %v188_v42, 0.0  ;;  %v118_v46 = vsel %vm80_vm1, %v114_v43, -inf }
 0x20c   :  { %v191_v47 = vadd.f32 %v190_v45, %v189_v44  ;;  %119 = vmax.index.xlane.f32.xlu1 %v118_v46 }
 0x20e   :  { %v192_v48 = vrot.slane %v191_v47, 4 }
 0x210   :  { %v193_v49 = vadd.f32 %v192_v48, %v191_v47 }
 0x212   :  { %v194_v50 = vrot.slane %v193_v49, 2 }
 0x214   :  { %v195_v51 = vadd.f32 %v194_v50, %v193_v49 }
 0x216   :  { %v196_v52 = vrot.slane %v195_v51, 1 }
 0x218   :  { %v197_v53 = vadd.f32 %v196_v52, %v195_v51 }
 0x21a   :  { %200 = vst.msk [vmem:[%s383_s3 + $0x1] sm:$0x1] %vm198_vm2, %v197_v53 }
 0x277   :  { %v117_v54 = vpop.xlane.xlu0 %116 }
 0x278   :  { %vm121_vm5 = vcmp.eq.s32.totalorder %v104_v35, %v117_v54 }
 0x279   :  { %vm123_vm6 = vmor %vm111_vm3, %vm121_vm5 }
 0x27a   :  { %v125_v55 = vsel %vm123_vm6, %v101_v19, 0.0 }
 0x27b   :  { %127 = vxpose.xlu2.b32.start [1/2] (short) (narrow) %v125_v55, 8 }
 0x27f   :  { %v120_v56 = vpop.xlane.xlu1 %119 }
 0x280   :  { %vm122_vm7 = vcmp.eq.s32.totalorder %v104_v35, %v120_v56 }
 0x281   :  { %vm124_vm8 = vmor %vm112_vm4, %vm122_vm7 }
 0x282   :  { %v126_v57 = vsel %vm124_vm8, %v102_v23, 0.0 }
 0x283   :  { %128 = vxpose.xlu2.b32.end [2/2] (short) (narrow) %v126_v57, 8 }
 0x314   :  { %v143_v58 = vpop.trf.xlu2 }
 0x315   :  { %160 = vst.msk [vmem:[#allocation7] sm:$0xff] %vm159_vm9, %v143_v58 }
 0x316   :  { %211 = dma.vmem_to_hbm [thread:$0]  %s207_s27, 128, %s209_s30, [#allocation4]  }
 0x317   :  { %317 = dma.done.wait [#allocation4], 128  }
 0x318   :  { %318 = vsyncadd [#allocation4], 4294967168 }
 0x319   :  { %220 = vsyncpa [#allocation3], 1 }
 0x31a   :  { %221 = vsyncpa [#allocation6], 1 }
 0x31b   :  { %222 = vsyncpa [#allocation4], 1 }

</bundles_post_ra>
